<compile_context>
chip_gen: v7x
topology: tpu7x:2x2x1
jax: 0.10.0
libtpu: 0.0.40
codegen_flags: <defaults>
</compile_context>

<pallas_src>
import functools
import math

import jax
import jax.numpy as jnp
from jax.experimental import pallas as pl
from jax.experimental.pallas import tpu as pltpu

_LN_EPS = 1e-5  # torch.nn.LayerNorm default


def _layernorm(x, gamma, beta):
    mean = jnp.mean(x, axis=-1, keepdims=True)
    centered = x - mean
    var = jnp.mean(centered * centered, axis=-1, keepdims=True)
    return centered * jax.lax.rsqrt(var + _LN_EPS) * gamma + beta


# ----------------------------------------------------------------------------
# Single fused kernel: one grid step = one batch element's full encoder layer.
# ----------------------------------------------------------------------------
def _encoder_layer_kernel(x_ref, pos_ref, wqk_ref, bqk_ref, wv_ref, bv_ref,
                          wo_ref, bo_ref, g1_ref, be1_ref, w1_ref, b1_ref,
                          w2_ref, b2_ref, g2_ref, be2_ref, o_ref,
                          *, nhead, scale):
    x = x_ref[0].astype(jnp.float32)              # (S, D) value / residual input
    xq = x + pos_ref[0].astype(jnp.float32)       # (S, D) q/k input (pos-embedded)

    d = x.shape[-1]
    dh = d // nhead

    # Fused Q|K projection (one (D, 2D) MXU matmul) + V projection.
    qk = jnp.dot(xq, wqk_ref[...], preferred_element_type=jnp.float32) + bqk_ref[...]
    v = jnp.dot(x, wv_ref[...], preferred_element_type=jnp.float32) + bv_ref[...]
    q = qk[:, :d] * scale                         # fold 1/sqrt(dh) into q once
    k = qk[:, d:]

    # Per-head softmax attention. Heads sliced statically; output re-assembled
    # lane-dense as (S, D) so the out-proj matmul and the final store are not
    # dh-wide (avoids vst.msk partial stores on the hot path).
    heads = []
    for h in range(nhead):
        sl = slice(h * dh, (h + 1) * dh)
        s = jax.lax.dot_general(q[:, sl], k[:, sl],
                                (((1,), (1,)), ((), ())),
                                preferred_element_type=jnp.float32)   # (S, S)
        m = jnp.max(s, axis=-1, keepdims=True)
        p = jnp.exp(s - m)
        l = jnp.sum(p, axis=-1, keepdims=True)
        oh = jnp.dot(p, v[:, sl], preferred_element_type=jnp.float32)  # (S, dh)
        heads.append(oh * pl.reciprocal(l, approx=True))               # EUP recip
    attn = jnp.concatenate(heads, axis=-1)                             # (S, D)

    # Attention out-proj + residual + LayerNorm1.
    h1 = jnp.dot(attn, wo_ref[...], preferred_element_type=jnp.float32) + bo_ref[...]
    n1 = _layernorm(x + h1, g1_ref[...], be1_ref[...])

    # FFN (ReLU) + residual + LayerNorm2.
    f = jnp.maximum(
        jnp.dot(n1, w1_ref[...], preferred_element_type=jnp.float32) + b1_ref[...],
        0.0)
    f2 = jnp.dot(f, w2_ref[...], preferred_element_type=jnp.float32) + b2_ref[...]
    o_ref[0] = _layernorm(n1 + f2, g2_ref[...], be2_ref[...]).astype(o_ref.dtype)


def encoder_layer_pallas(x_bsd, pos_bsd, params):
    b, s, d = x_bsd.shape
    nhead = params["nhead"]
    dh = d // nhead
    dff = params["w1"].shape[1]

    wqk = jnp.concatenate([params["wq"], params["wk"]], axis=1)          # (D, 2D)
    bqk = jnp.concatenate([params["bq"], params["bk"]]).reshape(1, 2 * d)

    batch_spec = pl.BlockSpec((1, s, d), lambda i: (i, 0, 0))

    def resident(shape):
        return pl.BlockSpec(shape, lambda i: (0,) * len(shape))

    kernel = functools.partial(_encoder_layer_kernel,
                               nhead=nhead, scale=1.0 / math.sqrt(dh))

    return pl.pallas_call(
        kernel,
        out_shape=jax.ShapeDtypeStruct((b, s, d), x_bsd.dtype),
        grid_spec=pltpu.PrefetchScalarGridSpec(
            num_scalar_prefetch=0,
            grid=(b,),
            in_specs=[batch_spec, batch_spec,
                      resident((d, 2 * d)), resident((1, 2 * d)),
                      resident((d, d)), resident((1, d)),
                      resident((d, d)), resident((1, d)),
                      resident((1, d)), resident((1, d)),
                      resident((d, dff)), resident((1, dff)),
                      resident((dff, d)), resident((1, d)),
                      resident((1, d)), resident((1, d))],
            out_specs=batch_spec,
        ),
        compiler_params=pltpu.CompilerParams(
            dimension_semantics=("parallel",),
            vmem_limit_bytes=48 * 1024 * 1024),
    )(x_bsd, pos_bsd, wqk, bqk,
      params["wv"], params["bv"].reshape(1, d),
      params["wo"], params["bo"].reshape(1, d),
      params["g1"].reshape(1, d), params["be1"].reshape(1, d),
      params["w1"], params["b1"].reshape(1, dff),
      params["w2"], params["b2"].reshape(1, d),
      params["g2"].reshape(1, d), params["be2"].reshape(1, d))


# ----------------------------------------------------------------------------
# Full layer forward (post-norm), src layout [S, B, D] like torch MHA default.
# ----------------------------------------------------------------------------
def transformer_encoder_layer_forward(src, params, pos=None):
    x_bsd = jnp.transpose(src, (1, 0, 2))                      # (B, S, D)
    # pos is added inside the kernel (saves materializing src+pos in HBM);
    # pos=None falls back to a zeros block.
    pos_bsd = (jnp.zeros_like(x_bsd) if pos is None
               else jnp.transpose(pos, (1, 0, 2)))
    out_bsd = encoder_layer_pallas(x_bsd, pos_bsd, params)
    return jnp.transpose(out_bsd, (1, 0, 2))                   # (S, B, D)


# ----------------------------------------------------------------------------
# Pure-JAX reference (same math, highest-precision dots)
# ----------------------------------------------------------------------------
def encoder_layer_reference(src, params, pos=None):
    hp = jax.lax.Precision.HIGHEST
    s, b, d = src.shape
    nhead = params["nhead"]
    dh = d // nhead
    x = src.reshape(s * b, d)
    xq = x if pos is None else (src + pos).reshape(s * b, d)

    q = jnp.dot(xq, params["wq"], precision=hp) + params["bq"]
    k = jnp.dot(xq, params["wk"], precision=hp) + params["bk"]
    v = jnp.dot(x, params["wv"], precision=hp) + params["bv"]

    def to_heads(t):
        return t.reshape(s, b, nhead, dh).transpose(1, 2, 0, 3).reshape(b * nhead, s, dh)

    qh, kh, vh = to_heads(q), to_heads(k), to_heads(v)
    sc = jnp.einsum("bqd,bkd->bqk", qh, kh, precision=hp) / math.sqrt(dh)
    p = jax.nn.softmax(sc, axis=-1)
    ah = jnp.einsum("bqk,bkd->bqd", p, vh, precision=hp)
    attn = ah.reshape(b, nhead, s, dh).transpose(2, 0, 1, 3).reshape(s * b, d)

    def ln(xx, g, be):
        mu = jnp.mean(xx, -1, keepdims=True)
        var = jnp.mean((xx - mu) ** 2, -1, keepdims=True)
        return (xx - mu) * jax.lax.rsqrt(var + _LN_EPS) * g + be

    h = jnp.dot(attn, params["wo"], precision=hp) + params["bo"]
    n1 = ln(x + h, params["g1"], params["be1"])
    f = jnp.maximum(jnp.dot(n1, params["w1"], precision=hp) + params["b1"], 0.0)
    f2 = jnp.dot(f, params["w2"], precision=hp) + params["b2"]
    out = ln(n1 + f2, params["g2"], params["be2"])
    return out.reshape(s, b, d)


# ----------------------------------------------------------------------------
# Parameter init (weights stored as [in_dim, out_dim], i.e. PyTorch W^T)
# ----------------------------------------------------------------------------
def init_encoder_layer_params(key, d_model, nhead, dim_feedforward):
    assert d_model % nhead == 0
    ks = jax.random.split(key, 16)

    def linear(kw, kb, din, dout):
        bound = 1.0 / math.sqrt(din)
        w = jax.random.uniform(kw, (din, dout), jnp.float32, -bound, bound)
        bb = jax.random.uniform(kb, (dout,), jnp.float32, -bound, bound)
        return w, bb

    wq, bq = linear(ks[0], ks[1], d_model, d_model)
    wk, bk = linear(ks[2], ks[3], d_model, d_model)
    wv, bv = linear(ks[4], ks[5], d_model, d_model)
    wo, bo = linear(ks[6], ks[7], d_model, d_model)
    w1, b1 = linear(ks[8], ks[9], d_model, dim_feedforward)
    w2, b2 = linear(ks[10], ks[11], dim_feedforward, d_model)
    g1 = 1.0 + 0.05 * jax.random.normal(ks[12], (d_model,), jnp.float32)
    be1 = 0.05 * jax.random.normal(ks[13], (d_model,), jnp.float32)
    g2 = 1.0 + 0.05 * jax.random.normal(ks[14], (d_model,), jnp.float32)
    be2 = 0.05 * jax.random.normal(ks[15], (d_model,), jnp.float32)
    return dict(nhead=nhead,
                wq=wq, bq=bq, wk=wk, bk=bk, wv=wv, bv=bv, wo=wo, bo=bo,
                w1=w1, b1=b1, w2=w2, b2=b2,
                g1=g1, be1=be1, g2=g2, be2=be2)


if __name__ == "__main__":
    key = jax.random.PRNGKey(0)
    k_src, k_pos, k_par = jax.random.split(key, 3)

    # Small shapes consistent with the module: src is [seq, batch, d_model].
    seq, batch, d_model, nhead, dim_ff = 8, 2, 32, 4, 64

    src = jax.random.normal(k_src, (seq, batch, d_model), jnp.float32)
    pos = jax.random.normal(k_pos, (seq, batch, d_model), jnp.float32)
    params = init_encoder_layer_params(k_par, d_model, nhead, dim_ff)

    out = transformer_encoder_layer_forward(src, params, pos=pos)
    out = jax.block_until_ready(out)

    ref = encoder_layer_reference(src, params, pos=pos)
    assert out.shape == (seq, batch, d_model)
    max_err = float(jnp.max(jnp.abs(out - ref)))
    # Tolerance accounts for MXU default-precision f32 dots and the EUP
    # approximate reciprocal used for the softmax normalization.
    assert jnp.allclose(out, ref, atol=2e-3, rtol=2e-3), f"max abs err {max_err}"

    print("KERNEL_OK")
</pallas_src>

<mosaic_0001>
module attributes {stable_mosaic.version = 11 : i64} {
  func.func @_encoder_layer_kernel(%arg0: i32, %arg1: memref<1x8x32xf32, #tpu.memory_space<vmem>>, %arg2: memref<1x8x32xf32, #tpu.memory_space<vmem>>, %arg3: memref<32x64xf32, #tpu.memory_space<vmem>>, %arg4: memref<1x64xf32, #tpu.memory_space<vmem>>, %arg5: memref<32x32xf32, #tpu.memory_space<vmem>>, %arg6: memref<1x32xf32, #tpu.memory_space<vmem>>, %arg7: memref<32x32xf32, #tpu.memory_space<vmem>>, %arg8: memref<1x32xf32, #tpu.memory_space<vmem>>, %arg9: memref<1x32xf32, #tpu.memory_space<vmem>>, %arg10: memref<1x32xf32, #tpu.memory_space<vmem>>, %arg11: memref<32x64xf32, #tpu.memory_space<vmem>>, %arg12: memref<1x64xf32, #tpu.memory_space<vmem>>, %arg13: memref<64x32xf32, #tpu.memory_space<vmem>>, %arg14: memref<1x32xf32, #tpu.memory_space<vmem>>, %arg15: memref<1x32xf32, #tpu.memory_space<vmem>>, %arg16: memref<1x32xf32, #tpu.memory_space<vmem>>, %arg17: memref<1x8x32xf32, #tpu.memory_space<vmem>>) attributes {dimension_semantics = [#tpu.dimension_semantics<parallel>], iteration_bounds = array<i64: 2>, scalar_prefetch = 0 : i64, scratch_operands = 0 : i64, tpu.core_type = #tpu.core_type<tc>, window_params = [{transform_indices = @transform_0, window_bounds = array<i64: 1, 8, 32>}, {transform_indices = @transform_1, window_bounds = array<i64: 1, 8, 32>}, {pipeline_mode = #tpu.pipeline_mode<synchronous>, transform_indices = @transform_2, window_bounds = array<i64: 32, 64>}, {pipeline_mode = #tpu.pipeline_mode<synchronous>, transform_indices = @transform_3, window_bounds = array<i64: 1, 64>}, {pipeline_mode = #tpu.pipeline_mode<synchronous>, transform_indices = @transform_4, window_bounds = array<i64: 32, 32>}, {pipeline_mode = #tpu.pipeline_mode<synchronous>, transform_indices = @transform_5, window_bounds = array<i64: 1, 32>}, {pipeline_mode = #tpu.pipeline_mode<synchronous>, transform_indices = @transform_6, window_bounds = array<i64: 32, 32>}, {pipeline_mode = #tpu.pipeline_mode<synchronous>, transform_indices = @transform_7, window_bounds = array<i64: 1, 32>}, {pipeline_mode = #tpu.pipeline_mode<synchronous>, transform_indices = @transform_8, window_bounds = array<i64: 1, 32>}, {pipeline_mode = #tpu.pipeline_mode<synchronous>, transform_indices = @transform_9, window_bounds = array<i64: 1, 32>}, {pipeline_mode = #tpu.pipeline_mode<synchronous>, transform_indices = @transform_10, window_bounds = array<i64: 32, 64>}, {pipeline_mode = #tpu.pipeline_mode<synchronous>, transform_indices = @transform_11, window_bounds = array<i64: 1, 64>}, {pipeline_mode = #tpu.pipeline_mode<synchronous>, transform_indices = @transform_12, window_bounds = array<i64: 64, 32>}, {pipeline_mode = #tpu.pipeline_mode<synchronous>, transform_indices = @transform_13, window_bounds = array<i64: 1, 32>}, {pipeline_mode = #tpu.pipeline_mode<synchronous>, transform_indices = @transform_14, window_bounds = array<i64: 1, 32>}, {pipeline_mode = #tpu.pipeline_mode<synchronous>, transform_indices = @transform_15, window_bounds = array<i64: 1, 32>}, {transform_indices = @transform_16, window_bounds = array<i64: 1, 8, 32>}]} {
    %c0 = arith.constant 0 : index
    %c0_0 = arith.constant 0 : index
    %c0_1 = arith.constant 0 : index
    %0 = vector.load %arg1[%c0, %c0_0, %c0_1] : memref<1x8x32xf32, #tpu.memory_space<vmem>>, vector<1x8x32xf32>
    %1 = vector.shape_cast %0 : vector<1x8x32xf32> to vector<8x32xf32>
    %c0_2 = arith.constant 0 : index
    %c0_3 = arith.constant 0 : index
    %c0_4 = arith.constant 0 : index
    %2 = vector.load %arg2[%c0_2, %c0_3, %c0_4] : memref<1x8x32xf32, #tpu.memory_space<vmem>>, vector<1x8x32xf32>
    %3 = vector.shape_cast %2 : vector<1x8x32xf32> to vector<8x32xf32>
    %4 = arith.addf %1, %3 : vector<8x32xf32>
    %c0_5 = arith.constant 0 : index
    %c0_6 = arith.constant 0 : index
    %5 = vector.load %arg3[%c0_5, %c0_6] : memref<32x64xf32, #tpu.memory_space<vmem>>, vector<32x64xf32>
    %cst = arith.constant dense<0.000000e+00> : vector<8x64xf32>
    %6 = tpu.matmul %4, %5, %cst {dimension_numbers = #tpu.dot_dimension_numbers<[1], [0], [0], [1], [0, 0, 1, 1], [], []>} : vector<8x32xf32>, vector<32x64xf32>, vector<8x64xf32> -> vector<8x64xf32>
    %c0_7 = arith.constant 0 : index
    %c0_8 = arith.constant 0 : index
    %7 = vector.load %arg4[%c0_7, %c0_8] : memref<1x64xf32, #tpu.memory_space<vmem>>, vector<1x64xf32>
    %8 = vector.broadcast %7 : vector<1x64xf32> to vector<8x64xf32>
    %9 = arith.addf %6, %8 : vector<8x64xf32>
    %c0_9 = arith.constant 0 : index
    %c0_10 = arith.constant 0 : index
    %10 = vector.load %arg5[%c0_9, %c0_10] : memref<32x32xf32, #tpu.memory_space<vmem>>, vector<32x32xf32>
    %cst_11 = arith.constant dense<0.000000e+00> : vector<8x32xf32>
    %11 = tpu.matmul %1, %10, %cst_11 {dimension_numbers = #tpu.dot_dimension_numbers<[1], [0], [0], [1], [0, 0, 1, 1], [], []>} : vector<8x32xf32>, vector<32x32xf32>, vector<8x32xf32> -> vector<8x32xf32>
    %c0_12 = arith.constant 0 : index
    %c0_13 = arith.constant 0 : index
    %12 = vector.load %arg6[%c0_12, %c0_13] : memref<1x32xf32, #tpu.memory_space<vmem>>, vector<1x32xf32>
    %13 = vector.broadcast %12 : vector<1x32xf32> to vector<8x32xf32>
    %14 = arith.addf %11, %13 : vector<8x32xf32>
    %15 = vector.extract_strided_slice %9 {offsets = [0, 0], sizes = [8, 32], strides = [1, 1]} : vector<8x64xf32> to vector<8x32xf32>
    %cst_14 = arith.constant 0.353553385 : f32
    %16 = vector.broadcast %cst_14 : f32 to vector<8x32xf32>
    %17 = arith.mulf %15, %16 : vector<8x32xf32>
    %18 = vector.extract_strided_slice %9 {offsets = [0, 32], sizes = [8, 32], strides = [1, 1]} : vector<8x64xf32> to vector<8x32xf32>
    %19 = vector.extract_strided_slice %17 {offsets = [0, 0], sizes = [8, 8], strides = [1, 1]} : vector<8x32xf32> to vector<8x8xf32>
    %20 = vector.extract_strided_slice %18 {offsets = [0, 0], sizes = [8, 8], strides = [1, 1]} : vector<8x32xf32> to vector<8x8xf32>
    %cst_15 = arith.constant dense<0.000000e+00> : vector<8x8xf32>
    %21 = tpu.matmul %19, %20, %cst_15 {dimension_numbers = #tpu.dot_dimension_numbers<[1], [1], [0], [0], [0, 0, 1, 0], [], []>} : vector<8x8xf32>, vector<8x8xf32>, vector<8x8xf32> -> vector<8x8xf32>
    %cst_16 = arith.constant dense<0xFF800000> : vector<8xf32>
    %22 = vector.multi_reduction <maximumf>, %21, %cst_16 [1] : vector<8x8xf32> to vector<8xf32>
    %23 = vector.shape_cast %22 : vector<8xf32> to vector<8x1xf32>
    %24 = vector.broadcast %23 : vector<8x1xf32> to vector<8x8xf32>
    %25 = arith.subf %21, %24 : vector<8x8xf32>
    %26 = math.exp %25 : vector<8x8xf32>
    %cst_17 = arith.constant dense<0.000000e+00> : vector<8xf32>
    %27 = vector.multi_reduction <add>, %26, %cst_17 [1] : vector<8x8xf32> to vector<8xf32>
    %28 = vector.shape_cast %27 : vector<8xf32> to vector<8x1xf32>
    %29 = vector.extract_strided_slice %14 {offsets = [0, 0], sizes = [8, 8], strides = [1, 1]} : vector<8x32xf32> to vector<8x8xf32>
    %cst_18 = arith.constant dense<0.000000e+00> : vector<8x8xf32>
    %30 = tpu.matmul %26, %29, %cst_18 {dimension_numbers = #tpu.dot_dimension_numbers<[1], [0], [0], [1], [0, 0, 1, 1], [], []>} : vector<8x8xf32>, vector<8x8xf32>, vector<8x8xf32> -> vector<8x8xf32>
    %31 = tpu.reciprocal %28 {approx = true} : vector<8x1xf32> -> vector<8x1xf32>
    %32 = vector.broadcast %31 : vector<8x1xf32> to vector<8x8xf32>
    %33 = arith.mulf %30, %32 : vector<8x8xf32>
    %34 = vector.extract_strided_slice %17 {offsets = [0, 8], sizes = [8, 8], strides = [1, 1]} : vector<8x32xf32> to vector<8x8xf32>
    %35 = vector.extract_strided_slice %18 {offsets = [0, 8], sizes = [8, 8], strides = [1, 1]} : vector<8x32xf32> to vector<8x8xf32>
    %cst_19 = arith.constant dense<0.000000e+00> : vector<8x8xf32>
    %36 = tpu.matmul %34, %35, %cst_19 {dimension_numbers = #tpu.dot_dimension_numbers<[1], [1], [0], [0], [0, 0, 1, 0], [], []>} : vector<8x8xf32>, vector<8x8xf32>, vector<8x8xf32> -> vector<8x8xf32>
    %cst_20 = arith.constant dense<0xFF800000> : vector<8xf32>
    %37 = vector.multi_reduction <maximumf>, %36, %cst_20 [1] : vector<8x8xf32> to vector<8xf32>
    %38 = vector.shape_cast %37 : vector<8xf32> to vector<8x1xf32>
    %39 = vector.broadcast %38 : vector<8x1xf32> to vector<8x8xf32>
    %40 = arith.subf %36, %39 : vector<8x8xf32>
    %41 = math.exp %40 : vector<8x8xf32>
    %cst_21 = arith.constant dense<0.000000e+00> : vector<8xf32>
    %42 = vector.multi_reduction <add>, %41, %cst_21 [1] : vector<8x8xf32> to vector<8xf32>
    %43 = vector.shape_cast %42 : vector<8xf32> to vector<8x1xf32>
    %44 = vector.extract_strided_slice %14 {offsets = [0, 8], sizes = [8, 8], strides = [1, 1]} : vector<8x32xf32> to vector<8x8xf32>
    %cst_22 = arith.constant dense<0.000000e+00> : vector<8x8xf32>
    %45 = tpu.matmul %41, %44, %cst_22 {dimension_numbers = #tpu.dot_dimension_numbers<[1], [0], [0], [1], [0, 0, 1, 1], [], []>} : vector<8x8xf32>, vector<8x8xf32>, vector<8x8xf32> -> vector<8x8xf32>
    %46 = tpu.reciprocal %43 {approx = true} : vector<8x1xf32> -> vector<8x1xf32>
    %47 = vector.broadcast %46 : vector<8x1xf32> to vector<8x8xf32>
    %48 = arith.mulf %45, %47 : vector<8x8xf32>
    %49 = vector.extract_strided_slice %17 {offsets = [0, 16], sizes = [8, 8], strides = [1, 1]} : vector<8x32xf32> to vector<8x8xf32>
    %50 = vector.extract_strided_slice %18 {offsets = [0, 16], sizes = [8, 8], strides = [1, 1]} : vector<8x32xf32> to vector<8x8xf32>
    %cst_23 = arith.constant dense<0.000000e+00> : vector<8x8xf32>
    %51 = tpu.matmul %49, %50, %cst_23 {dimension_numbers = #tpu.dot_dimension_numbers<[1], [1], [0], [0], [0, 0, 1, 0], [], []>} : vector<8x8xf32>, vector<8x8xf32>, vector<8x8xf32> -> vector<8x8xf32>
    %cst_24 = arith.constant dense<0xFF800000> : vector<8xf32>
    %52 = vector.multi_reduction <maximumf>, %51, %cst_24 [1] : vector<8x8xf32> to vector<8xf32>
    %53 = vector.shape_cast %52 : vector<8xf32> to vector<8x1xf32>
    %54 = vector.broadcast %53 : vector<8x1xf32> to vector<8x8xf32>
    %55 = arith.subf %51, %54 : vector<8x8xf32>
    %56 = math.exp %55 : vector<8x8xf32>
    %cst_25 = arith.constant dense<0.000000e+00> : vector<8xf32>
    %57 = vector.multi_reduction <add>, %56, %cst_25 [1] : vector<8x8xf32> to vector<8xf32>
    %58 = vector.shape_cast %57 : vector<8xf32> to vector<8x1xf32>
    %59 = vector.extract_strided_slice %14 {offsets = [0, 16], sizes = [8, 8], strides = [1, 1]} : vector<8x32xf32> to vector<8x8xf32>
    %cst_26 = arith.constant dense<0.000000e+00> : vector<8x8xf32>
    %60 = tpu.matmul %56, %59, %cst_26 {dimension_numbers = #tpu.dot_dimension_numbers<[1], [0], [0], [1], [0, 0, 1, 1], [], []>} : vector<8x8xf32>, vector<8x8xf32>, vector<8x8xf32> -> vector<8x8xf32>
    %61 = tpu.reciprocal %58 {approx = true} : vector<8x1xf32> -> vector<8x1xf32>
    %62 = vector.broadcast %61 : vector<8x1xf32> to vector<8x8xf32>
    %63 = arith.mulf %60, %62 : vector<8x8xf32>
    %64 = vector.extract_strided_slice %17 {offsets = [0, 24], sizes = [8, 8], strides = [1, 1]} : vector<8x32xf32> to vector<8x8xf32>
    %65 = vector.extract_strided_slice %18 {offsets = [0, 24], sizes = [8, 8], strides = [1, 1]} : vector<8x32xf32> to vector<8x8xf32>
    %cst_27 = arith.constant dense<0.000000e+00> : vector<8x8xf32>
    %66 = tpu.matmul %64, %65, %cst_27 {dimension_numbers = #tpu.dot_dimension_numbers<[1], [1], [0], [0], [0, 0, 1, 0], [], []>} : vector<8x8xf32>, vector<8x8xf32>, vector<8x8xf32> -> vector<8x8xf32>
    %cst_28 = arith.constant dense<0xFF800000> : vector<8xf32>
    %67 = vector.multi_reduction <maximumf>, %66, %cst_28 [1] : vector<8x8xf32> to vector<8xf32>
    %68 = vector.shape_cast %67 : vector<8xf32> to vector<8x1xf32>
    %69 = vector.broadcast %68 : vector<8x1xf32> to vector<8x8xf32>
    %70 = arith.subf %66, %69 : vector<8x8xf32>
    %71 = math.exp %70 : vector<8x8xf32>
    %cst_29 = arith.constant dense<0.000000e+00> : vector<8xf32>
    %72 = vector.multi_reduction <add>, %71, %cst_29 [1] : vector<8x8xf32> to vector<8xf32>
    %73 = vector.shape_cast %72 : vector<8xf32> to vector<8x1xf32>
    %74 = vector.extract_strided_slice %14 {offsets = [0, 24], sizes = [8, 8], strides = [1, 1]} : vector<8x32xf32> to vector<8x8xf32>
    %cst_30 = arith.constant dense<0.000000e+00> : vector<8x8xf32>
    %75 = tpu.matmul %71, %74, %cst_30 {dimension_numbers = #tpu.dot_dimension_numbers<[1], [0], [0], [1], [0, 0, 1, 1], [], []>} : vector<8x8xf32>, vector<8x8xf32>, vector<8x8xf32> -> vector<8x8xf32>
    %76 = tpu.reciprocal %73 {approx = true} : vector<8x1xf32> -> vector<8x1xf32>
    %77 = vector.broadcast %76 : vector<8x1xf32> to vector<8x8xf32>
    %78 = arith.mulf %75, %77 : vector<8x8xf32>
    %79 = tpu.concatenate %33, %48, %63, %78 in 1 : vector<8x8xf32>, vector<8x8xf32>, vector<8x8xf32>, vector<8x8xf32> -> vector<8x32xf32>
    %c0_31 = arith.constant 0 : index
    %c0_32 = arith.constant 0 : index
    %80 = vector.load %arg7[%c0_31, %c0_32] : memref<32x32xf32, #tpu.memory_space<vmem>>, vector<32x32xf32>
    %cst_33 = arith.constant dense<0.000000e+00> : vector<8x32xf32>
    %81 = tpu.matmul %79, %80, %cst_33 {dimension_numbers = #tpu.dot_dimension_numbers<[1], [0], [0], [1], [0, 0, 1, 1], [], []>} : vector<8x32xf32>, vector<32x32xf32>, vector<8x32xf32> -> vector<8x32xf32>
    %c0_34 = arith.constant 0 : index
    %c0_35 = arith.constant 0 : index
    %82 = vector.load %arg8[%c0_34, %c0_35] : memref<1x32xf32, #tpu.memory_space<vmem>>, vector<1x32xf32>
    %83 = vector.broadcast %82 : vector<1x32xf32> to vector<8x32xf32>
    %84 = arith.addf %81, %83 : vector<8x32xf32>
    %85 = arith.addf %1, %84 : vector<8x32xf32>
    %c0_36 = arith.constant 0 : index
    %c0_37 = arith.constant 0 : index
    %86 = vector.load %arg9[%c0_36, %c0_37] : memref<1x32xf32, #tpu.memory_space<vmem>>, vector<1x32xf32>
    %c0_38 = arith.constant 0 : index
    %c0_39 = arith.constant 0 : index
    %87 = vector.load %arg10[%c0_38, %c0_39] : memref<1x32xf32, #tpu.memory_space<vmem>>, vector<1x32xf32>
    %cst_40 = arith.constant dense<0.000000e+00> : vector<8xf32>
    %88 = vector.multi_reduction <add>, %85, %cst_40 [1] : vector<8x32xf32> to vector<8xf32>
    %89 = vector.shape_cast %88 : vector<8xf32> to vector<8x1xf32>
    %cst_41 = arith.constant 3.200000e+01 : f32
    %90 = vector.broadcast %cst_41 : f32 to vector<8x1xf32>
    %91 = arith.divf %89, %90 : vector<8x1xf32>
    %92 = vector.broadcast %91 : vector<8x1xf32> to vector<8x32xf32>
    %93 = arith.subf %85, %92 : vector<8x32xf32>
    %94 = arith.mulf %93, %93 : vector<8x32xf32>
    %cst_42 = arith.constant dense<0.000000e+00> : vector<8xf32>
    %95 = vector.multi_reduction <add>, %94, %cst_42 [1] : vector<8x32xf32> to vector<8xf32>
    %96 = vector.shape_cast %95 : vector<8xf32> to vector<8x1xf32>
    %cst_43 = arith.constant 3.200000e+01 : f32
    %97 = vector.broadcast %cst_43 : f32 to vector<8x1xf32>
    %98 = arith.divf %96, %97 : vector<8x1xf32>
    %cst_44 = arith.constant 9.99999974E-6 : f32
    %99 = vector.broadcast %cst_44 : f32 to vector<8x1xf32>
    %100 = arith.addf %98, %99 : vector<8x1xf32>
    %101 = math.rsqrt %100 : vector<8x1xf32>
    %102 = vector.broadcast %101 : vector<8x1xf32> to vector<8x32xf32>
    %103 = arith.mulf %93, %102 : vector<8x32xf32>
    %104 = vector.broadcast %86 : vector<1x32xf32> to vector<8x32xf32>
    %105 = arith.mulf %103, %104 : vector<8x32xf32>
    %106 = vector.broadcast %87 : vector<1x32xf32> to vector<8x32xf32>
    %107 = arith.addf %105, %106 : vector<8x32xf32>
    %c0_45 = arith.constant 0 : index
    %c0_46 = arith.constant 0 : index
    %108 = vector.load %arg11[%c0_45, %c0_46] : memref<32x64xf32, #tpu.memory_space<vmem>>, vector<32x64xf32>
    %cst_47 = arith.constant dense<0.000000e+00> : vector<8x64xf32>
    %109 = tpu.matmul %107, %108, %cst_47 {dimension_numbers = #tpu.dot_dimension_numbers<[1], [0], [0], [1], [0, 0, 1, 1], [], []>} : vector<8x32xf32>, vector<32x64xf32>, vector<8x64xf32> -> vector<8x64xf32>
    %c0_48 = arith.constant 0 : index
    %c0_49 = arith.constant 0 : index
    %110 = vector.load %arg12[%c0_48, %c0_49] : memref<1x64xf32, #tpu.memory_space<vmem>>, vector<1x64xf32>
    %111 = vector.broadcast %110 : vector<1x64xf32> to vector<8x64xf32>
    %112 = arith.addf %109, %111 : vector<8x64xf32>
    %cst_50 = arith.constant 0.000000e+00 : f32
    %113 = vector.broadcast %cst_50 : f32 to vector<8x64xf32>
    %114 = arith.maximumf %112, %113 : vector<8x64xf32>
    %c0_51 = arith.constant 0 : index
    %c0_52 = arith.constant 0 : index
    %115 = vector.load %arg13[%c0_51, %c0_52] : memref<64x32xf32, #tpu.memory_space<vmem>>, vector<64x32xf32>
    %cst_53 = arith.constant dense<0.000000e+00> : vector<8x32xf32>
    %116 = tpu.matmul %114, %115, %cst_53 {dimension_numbers = #tpu.dot_dimension_numbers<[1], [0], [0], [1], [0, 0, 1, 1], [], []>} : vector<8x64xf32>, vector<64x32xf32>, vector<8x32xf32> -> vector<8x32xf32>
    %c0_54 = arith.constant 0 : index
    %c0_55 = arith.constant 0 : index
    %117 = vector.load %arg14[%c0_54, %c0_55] : memref<1x32xf32, #tpu.memory_space<vmem>>, vector<1x32xf32>
    %118 = vector.broadcast %117 : vector<1x32xf32> to vector<8x32xf32>
    %119 = arith.addf %116, %118 : vector<8x32xf32>
    %120 = arith.addf %107, %119 : vector<8x32xf32>
    %c0_56 = arith.constant 0 : index
    %c0_57 = arith.constant 0 : index
    %121 = vector.load %arg15[%c0_56, %c0_57] : memref<1x32xf32, #tpu.memory_space<vmem>>, vector<1x32xf32>
    %c0_58 = arith.constant 0 : index
    %c0_59 = arith.constant 0 : index
    %122 = vector.load %arg16[%c0_58, %c0_59] : memref<1x32xf32, #tpu.memory_space<vmem>>, vector<1x32xf32>
    %cst_60 = arith.constant dense<0.000000e+00> : vector<8xf32>
    %123 = vector.multi_reduction <add>, %120, %cst_60 [1] : vector<8x32xf32> to vector<8xf32>
    %124 = vector.shape_cast %123 : vector<8xf32> to vector<8x1xf32>
    %cst_61 = arith.constant 3.200000e+01 : f32
    %125 = vector.broadcast %cst_61 : f32 to vector<8x1xf32>
    %126 = arith.divf %124, %125 : vector<8x1xf32>
    %127 = vector.broadcast %126 : vector<8x1xf32> to vector<8x32xf32>
    %128 = arith.subf %120, %127 : vector<8x32xf32>
    %129 = arith.mulf %128, %128 : vector<8x32xf32>
    %cst_62 = arith.constant dense<0.000000e+00> : vector<8xf32>
    %130 = vector.multi_reduction <add>, %129, %cst_62 [1] : vector<8x32xf32> to vector<8xf32>
    %131 = vector.shape_cast %130 : vector<8xf32> to vector<8x1xf32>
    %cst_63 = arith.constant 3.200000e+01 : f32
    %132 = vector.broadcast %cst_63 : f32 to vector<8x1xf32>
    %133 = arith.divf %131, %132 : vector<8x1xf32>
    %cst_64 = arith.constant 9.99999974E-6 : f32
    %134 = vector.broadcast %cst_64 : f32 to vector<8x1xf32>
    %135 = arith.addf %133, %134 : vector<8x1xf32>
    %136 = math.rsqrt %135 : vector<8x1xf32>
    %137 = vector.broadcast %136 : vector<8x1xf32> to vector<8x32xf32>
    %138 = arith.mulf %128, %137 : vector<8x32xf32>
    %139 = vector.broadcast %121 : vector<1x32xf32> to vector<8x32xf32>
    %140 = arith.mulf %138, %139 : vector<8x32xf32>
    %141 = vector.broadcast %122 : vector<1x32xf32> to vector<8x32xf32>
    %142 = arith.addf %140, %141 : vector<8x32xf32>
    %c0_65 = arith.constant 0 : index
    %c0_66 = arith.constant 0 : index
    %c0_67 = arith.constant 0 : index
    %143 = vector.load %arg17[%c0_65, %c0_66, %c0_67] : memref<1x8x32xf32, #tpu.memory_space<vmem>>, vector<1x8x32xf32>
    %144 = vector.shape_cast %143 : vector<1x8x32xf32> to vector<8x32xf32>
    %145 = vector.shape_cast %142 : vector<8x32xf32> to vector<1x8x32xf32>
    tpu.vector_store %arg17[%c0_65, %c0_66, %c0_67], %145 {strides = array<i32>} : memref<1x8x32xf32, #tpu.memory_space<vmem>>, vector<1x8x32xf32>,
    return
  }
  func.func @transform_0(%arg0: i32) -> (i32, i32, i32) {
    %c0_i32 = arith.constant 0 : i32
    %c0_i32_0 = arith.constant 0 : i32
    %c0_i32_1 = arith.constant 0 : i32
    return %arg0, %c0_i32, %c0_i32_0 : i32, i32, i32
  }
  func.func @transform_1(%arg0: i32) -> (i32, i32, i32) {
    %c0_i32 = arith.constant 0 : i32
    %c0_i32_0 = arith.constant 0 : i32
    %c0_i32_1 = arith.constant 0 : i32
    return %arg0, %c0_i32, %c0_i32_0 : i32, i32, i32
  }
  func.func @transform_2(%arg0: i32) -> (i32, i32) {
    %c0_i32 = arith.constant 0 : i32
    %c0_i32_0 = arith.constant 0 : i32
    %c0_i32_1 = arith.constant 0 : i32
    return %c0_i32, %c0_i32_0 : i32, i32
  }
  func.func @transform_3(%arg0: i32) -> (i32, i32) {
    %c0_i32 = arith.constant 0 : i32
    %c0_i32_0 = arith.constant 0 : i32
    %c0_i32_1 = arith.constant 0 : i32
    return %c0_i32, %c0_i32_0 : i32, i32
  }
  func.func @transform_4(%arg0: i32) -> (i32, i32) {
    %c0_i32 = arith.constant 0 : i32
    %c0_i32_0 = arith.constant 0 : i32
    %c0_i32_1 = arith.constant 0 : i32
    return %c0_i32, %c0_i32_0 : i32, i32
  }
  func.func @transform_5(%arg0: i32) -> (i32, i32) {
    %c0_i32 = arith.constant 0 : i32
    %c0_i32_0 = arith.constant 0 : i32
    %c0_i32_1 = arith.constant 0 : i32
    return %c0_i32, %c0_i32_0 : i32, i32
  }
  func.func @transform_6(%arg0: i32) -> (i32, i32) {
    %c0_i32 = arith.constant 0 : i32
    %c0_i32_0 = arith.constant 0 : i32
    %c0_i32_1 = arith.constant 0 : i32
    return %c0_i32, %c0_i32_0 : i32, i32
  }
  func.func @transform_7(%arg0: i32) -> (i32, i32) {
    %c0_i32 = arith.constant 0 : i32
    %c0_i32_0 = arith.constant 0 : i32
    %c0_i32_1 = arith.constant 0 : i32
    return %c0_i32, %c0_i32_0 : i32, i32
  }
  func.func @transform_8(%arg0: i32) -> (i32, i32) {
    %c0_i32 = arith.constant 0 : i32
    %c0_i32_0 = arith.constant 0 : i32
    %c0_i32_1 = arith.constant 0 : i32
    return %c0_i32, %c0_i32_0 : i32, i32
  }
  func.func @transform_9(%arg0: i32) -> (i32, i32) {
    %c0_i32 = arith.constant 0 : i32
    %c0_i32_0 = arith.constant 0 : i32
    %c0_i32_1 = arith.constant 0 : i32
    return %c0_i32, %c0_i32_0 : i32, i32
  }
  func.func @transform_10(%arg0: i32) -> (i32, i32) {
    %c0_i32 = arith.constant 0 : i32
    %c0_i32_0 = arith.constant 0 : i32
    %c0_i32_1 = arith.constant 0 : i32
    return %c0_i32, %c0_i32_0 : i32, i32
  }
  func.func @transform_11(%arg0: i32) -> (i32, i32) {
    %c0_i32 = arith.constant 0 : i32
    %c0_i32_0 = arith.constant 0 : i32
    %c0_i32_1 = arith.constant 0 : i32
    return %c0_i32, %c0_i32_0 : i32, i32
  }
  func.func @transform_12(%arg0: i32) -> (i32, i32) {
    %c0_i32 = arith.constant 0 : i32
    %c0_i32_0 = arith.constant 0 : i32
    %c0_i32_1 = arith.constant 0 : i32
    return %c0_i32, %c0_i32_0 : i32, i32
  }
  func.func @transform_13(%arg0: i32) -> (i32, i32) {
    %c0_i32 = arith.constant 0 : i32
    %c0_i32_0 = arith.constant 0 : i32
    %c0_i32_1 = arith.constant 0 : i32
    return %c0_i32, %c0_i32_0 : i32, i32
  }
  func.func @transform_14(%arg0: i32) -> (i32, i32) {
    %c0_i32 = arith.constant 0 : i32
    %c0_i32_0 = arith.constant 0 : i32
    %c0_i32_1 = arith.constant 0 : i32
    return %c0_i32, %c0_i32_0 : i32, i32
  }
  func.func @transform_15(%arg0: i32) -> (i32, i32) {
    %c0_i32 = arith.constant 0 : i32
    %c0_i32_0 = arith.constant 0 : i32
    %c0_i32_1 = arith.constant 0 : i32
    return %c0_i32, %c0_i32_0 : i32, i32
  }
  func.func @transform_16(%arg0: i32) -> (i32, i32, i32) {
    %c0_i32 = arith.constant 0 : i32
    %c0_i32_0 = arith.constant 0 : i32
    %c0_i32_1 = arith.constant 0 : i32
    return %arg0, %c0_i32, %c0_i32_0 : i32, i32, i32
  }
}

</mosaic_0001>

<bundles_post_ra>
// kernel: tpu_custom_call.1
= control target key start
LH: loop header
LB: loop body
LE: loop exit
PB: predicated region body
PF: predicated region fallthrough
CT: control target
= control target key end

     0   :  { %s2874_s0 = inlined_call_operand.hbm [shape: f32[2,8,32], index: 0, kind: input, shape index: {}]   ;;  %s2875_s1 = inlined_call_operand.hbm [shape: f32[2,8,32], index: 1, kind: input, shape index: {}]   ;;  %s2876_s2 = inlined_call_operand.vmem [shape: f32[32,64], index: 2, kind: input, shape index: {}]   ;;  %s2877_s3 = inlined_call_operand.vmem [shape: f32[1,64], index: 3, kind: input, shape index: {}]   ;;  %s2878_s4 = inlined_call_operand.vmem [shape: f32[32,32], index: 4, kind: input, shape index: {}]   ;;  %s2879_s5 = inlined_call_operand.vmem [shape: f32[1,32], index: 5, kind: input, shape index: {}]   ;;  %s2880_s6 = inlined_call_operand.vmem [shape: f32[32,32], index: 6, kind: input, shape index: {}]   ;;  %s2881_s7 = inlined_call_operand.vmem [shape: f32[1,32], index: 7, kind: input, shape index: {}]   ;;  %s2882_s8 = inlined_call_operand.vmem [shape: f32[1,32], index: 8, kind: input, shape index: {}]   ;;  %s2883_s9 = inlined_call_operand.vmem [shape: f32[1,32], index: 9, kind: input, shape index: {}]   ;;  %s2884_s10 = inlined_call_operand.hbm [shape: f32[32,64], index: 10, kind: input, shape index: {}]   ;;  %s2885_s11 = inlined_call_operand.vmem [shape: f32[1,64], index: 11, kind: input, shape index: {}]   ;;  %s2886_s12 = inlined_call_operand.vmem [shape: f32[64,32], index: 12, kind: input, shape index: {}]   ;;  %s2887_s13 = inlined_call_operand.vmem [shape: f32[1,32], index: 13, kind: input, shape index: {}]   ;;  %s2888_s14 = inlined_call_operand.vmem [shape: f32[1,32], index: 14, kind: input, shape index: {}]   ;;  %s2889_s15 = inlined_call_operand.vmem [shape: f32[1,32], index: 15, kind: input, shape index: {}]   ;;  %s2890_s16 = inlined_call_operand.hbm [shape: f32[2,8,32], index: 16, kind: output, shape index: {}]  }
   0x1   :  { %2904 = sst [smem:[#allocation19_spill]] %s2874_s0 }
   0x2   :  { %2905 = sst [smem:[#allocation20_spill]] %s2883_s9 }
   0x3   :  { %2906 = sst [smem:[#allocation21_spill]] %s2884_s10 }
   0x4   :  { %2907 = sst [smem:[#allocation22_spill]] %s2885_s11 }
   0x5   :  { %2908 = sst [smem:[#allocation23_spill]] %s2887_s13 }
   0x6   :  { %2909 = sst [smem:[#allocation24_spill]] %s2888_s14 }
   0x7   :  { %2910 = sst [smem:[#allocation25_spill]] %s2889_s15 }
   0x8   :  { %2911 = sst [smem:[#allocation26_spill]] %s2890_s16 }
   0x9   :  { %21 = vsyncpa [#allocation3], 0 }
   0xa   :  { %23 = vsyncpa [#allocation3 + $0x1], 0 }
   0xb   :  { %24 = vsyncpa [#allocation6], 0 }
   0xc   :  { %26 = vsyncpa [#allocation6 + $0x1], 0 }
   0xd   :  { %27 = vsyncpa [#allocation4], 0 }
   0xe   :  { %29 = vsyncpa [#allocation4 + $0x1], 0  ;;  %s2465_s21 = smov 0   ;;  %s2467_s22 = smov 0  }
   0xf   :  { %s2469_s23 = smov 0   ;;  %s2471_s24 = smov 0  }
  0x10 LB: > { %2912 = sst [smem:[#allocation13_spill]] %s2347_s21  ;;  %s2486_s25 = sadd.s32 4294967295, %s2359_s24   ;;  %s2359_s24 = sphi %s2471_s24, %s2943_s24   ;;  %s2355_s23 = sphi %s2469_s23, %s2945_s23   ;;  %s2351_s22 = sphi %s2467_s22, %s2947_s22   ;;  %s2347_s21 = sphi %s2465_s21, %s2946_s21  }
  0x11   : > { %2913 = sst [smem:[#allocation14_spill]] %s2355_s23  ;;  %s1873_s26 = sadd.s32 4294967294, %s2359_s24  }
  0x12   : > { %p55_p0 = scmp.ne.s32.totalorder %s2351_s22, %s2347_s21  ;;  %p2897_p1 = scmp.eq.s32.totalorder %s2486_s25, 0 }
  0x13   : > { %p405_p3 = scmp.eq.s32.totalorder %s1873_s26, 1  ;;  %p1874_p5 = scmp.ge.s32.totalorder %s2359_s24, 1 }
  0x14   : > { %p2495_p4 = por %p2897_p1, %p55_p0  ;;  %p412_p7 = scmp.lt.s32.totalorder %s2359_s24, 3 }
  0x15   : > { %p2500_p6 = por %p405_p3, %p55_p0  ;;  %s2361_s30 = smov [#allocation7]  }
  0x16   : > { %s2914_s27 = scalar_select %p2495_p4, 1, 0 }
  0x17   : > { %s2915_s28 = scalar_select %p2500_p6, 1, 0 }
  0x18   : > { %p2505_p8 = pnand %p1874_p5, %p412_p7  ;;  %s448_s0 = sshll.u32 %s2361_s30, 4  ;;  %s2509_s0 = int_to_ptr.vmem [resolvable:$true] %s448_s0 }
  0x19   : > { %2916 = sst [smem:[#allocation15_spill]] %s2915_s28  ;;  %s2521_s18 = sadd.s32 1, %s2359_s24  }
  0x1a   : > { %s2917_s29 = scalar_select %p2505_p8, 1, 0 }
  0x1b   : > { %p2110_p9 = pneg %p2505_p8  ;;  %2919 = sst [smem:[#allocation16_spill]] %s2521_s18 }
  0x1c   : > { %s42_s19 = sadd.s32 1, %s2355_s23  ;;  %s39_s20 = ssub.s32 %s2359_s24, %s2521_s18 }
  0x1d   : > { %p2516_p11 = pnand %p2110_p9, %p2897_p1  ;;  %s2920_s10 = sld [smem:[#allocation21_spill]] }
  0x1f   : > { %p2199_p13 = pneg %p2516_p11 }
  0x23   : > { %s2197_s30 = scalar_lea.hbm %s2920_s10, 512 }
  0x24   : > { %p2198_p12 = scmp.ne.s32.totalorder %s2920_s10, %s2197_s30  ;;  %p2204_p5 = scmp.lt.u32.totalorder %s2197_s30, %s2920_s10 }
  0x26   : > { %p2200_p0 = pnand %p2199_p13, %p2198_p12 }
  0x28   : > { %p2201_p3 = pneg %p2200_p0 }
  0x2a   : > { %p2206_p7 = pnand %p2204_p5, %p2201_p3 }
  0x2c   : > { %2209 = shalt.err (!%p2206_p7)
}
  0x2d   : > { %s2210_s18 = scalar_lea.vmem %s2509_s0, 512  ;;  %p2218_p2 = scmp.lt.s32.totalorder %s2509_s0, %s2509_s0 }
  0x2e   : > { %p2211_p9 = scmp.ne.s32.totalorder %s2509_s0, %s2210_s18  ;;  %p2219_p6 = scmp.lt.s32.totalorder %s2210_s18, %s2210_s18 }
  0x30   : > { %p2213_p10 = pnand %p2211_p9, %p2199_p13  ;;  %p2220_p4 = por %p2219_p6, %p2218_p2 }
  0x32   : > { %p2214_p1 = pneg %p2213_p10 }
  0x34   : > { %p2221_p8 = pnand %p2220_p4, %p2214_p1 }
  0x36   : > { %2224 = shalt.err (!%p2221_p8)
}
  0x37   : > { %s2362_s16 = smov 128   ;;  %s2363_s14 = smov 8  }
  0x38   : > { %2113 = dma.hbm_to_vmem [thread:$0]  (!%p2516_p11), %s2920_s10, 512, %s2509_s0, [#allocation6], %s2362_s16, %s2362_s16, %s2363_s14  }
  0x39   : > { %p40_p2 = scmp.eq.s32.totalorder %s39_s20, 0  ;;  %p49_p1 = scmp.ne.s32.totalorder %s2355_s23, %s2351_s22 }
  0x3a   : > { %p50_p4 = scmp.eq.s32.totalorder %s2359_s24, 0  ;;  %p2126_p6 = scmp.lt.s32.totalorder %s2359_s24, 2 }
  0x3b   : > { %s2552_s28 = scalar_select %p40_p2, %s2355_s23, %s42_s19  }
  0x3c   : > { %p51_p8 = por %p50_p4, %p49_p1  ;;  %p2922_p10 = scmp.eq.s32.totalorder %s2486_s25, 1 }
  0x3d   : > { %2921 = sst [smem:[#allocation17_spill]] %s2552_s28  ;;  %s477_s26 = sand.u32 1, %s2355_s23  }
  0x3e   : > { %p2556_p12 = por %p2922_p10, %p49_p1  ;;  %s1878_s30 = sshll.u32 %s2359_s24, 7 }
  0x3f   : > { %s2562_s13 = sshll.u32 %s477_s26, 3  ;;  %s2925_s15 = sld [smem:[#allocation19_spill]] }
  0x40   : > { %s2923_s18 = scalar_select %p2556_p12, 1, 0 }
  0x41   : > { %s481_s19 = scalar_lea.vmem [#allocation2], %s2562_s13  ;;  %p2570_p11 = pnand %p2126_p6, %p51_p8 }
  0x42   : > { %2924 = sst [smem:[#allocation18_spill]] %s2923_s18  ;;  %s488_s20 = sshll.u32 %s481_s19, 4  ;;  %s2574_s20 = int_to_ptr.vmem [resolvable:$true] %s488_s20 }
  0x43   : > { %s2579_s11 = scalar_lea.hbm %s2875_s1, %s1878_s30  ;;  %s478_s17 = scalar_lea.sflag [#allocation3], %s477_s26 }
  0x44   : > { %p2227_p0 = pneg %p2570_p11 }
  0x45   : > { %s2567_s0 = scalar_lea.hbm %s2925_s15, %s1878_s30  ;;  %s2230_s23 = scalar_lea.hbm %s2925_s15, 256 }
  0x46   : > { %s2225_s10 = scalar_lea.hbm %s2567_s0, 128  ;;  %p2231_p7 = scmp.lt.u32.totalorder %s2567_s0, %s2925_s15 }
  0x47   : > { %p2226_p13 = scmp.ne.s32.totalorder %s2567_s0, %s2225_s10  ;;  %p2232_p9 = scmp.lt.u32.totalorder %s2230_s23, %s2225_s10 }
  0x48   : > { %p2234_p1 = scmp.lt.u32.totalorder %s2225_s10, %s2567_s0 }
  0x49   : > { %p2228_p3 = pnand %p2227_p0, %p2226_p13  ;;  %p2233_p2 = por %p2232_p9, %p2231_p7 }
  0x4b   : > { %p2229_p5 = pneg %p2228_p3  ;;  %p2235_p4 = por %p2234_p1, %p2233_p2 }
  0x4d   : > { %p2236_p6 = pnand %p2235_p4, %p2229_p5 }
  0x4f   : > { %2239 = shalt.err (!%p2236_p6)
}
  0x50   : > { %s2240_s26 = scalar_lea.vmem %s2574_s20, 128  ;;  %s2364_s28 = smov [#allocation2]  }
  0x51   : > { %p2241_p8 = scmp.ne.s32.totalorder %s2574_s20, %s2240_s26  ;;  %s2245_s30 = sshll.u32 %s2364_s28, 4  ;;  %s2246_s30 = int_to_ptr.vmem [resolvable:$false] %s2245_s30 }
  0x52   : > { %s2247_s9 = scalar_lea.vmem %s2246_s30, 256  ;;  %p2248_p3 = scmp.lt.s32.totalorder %s2574_s20, %s2246_s30 }
  0x53   : > { %p2243_p10 = pnand %p2241_p8, %p2227_p0  ;;  %p2249_p7 = scmp.lt.s32.totalorder %s2247_s9, %s2240_s26 }
  0x55   : > { %p2244_p13 = pneg %p2243_p10  ;;  %p2250_p9 = por %p2249_p7, %p2248_p3 }
  0x57   : > { %p2251_p2 = pnand %p2250_p9, %p2244_p13 }
  0x59   : > { %2254 = shalt.err (!%p2251_p2)
}
  0x5a   : > { %2117 = dma.hbm_to_vmem [thread:$0]  (!%p2570_p11), %s2567_s0, 128, %s2574_s20, %s478_s17  }
  0x5b   : > { %s495_s10 = sand.u32 1, %s2359_s24   ;;  %s499_s23 = scalar_lea.vmem [#allocation5], %s2562_s13 }
  0x5c   : > { %s506_s18 = sshll.u32 %s499_s23, 4  ;;  %s496_s14 = scalar_lea.sflag [#allocation6], %s495_s10  ;;  %s507_s18 = int_to_ptr.vmem [resolvable:$true] %s506_s18 }
  0x5d   : > { %s2255_s21 = scalar_lea.hbm %s2579_s11, 128  ;;  %s2260_s28 = scalar_lea.hbm %s2875_s1, 256 }
  0x5e   : > { %p2256_p5 = scmp.ne.s32.totalorder %s2579_s11, %s2255_s21  ;;  %p2261_p6 = scmp.lt.u32.totalorder %s2579_s11, %s2875_s1 }
  0x5f   : > { %p2262_p8 = scmp.lt.u32.totalorder %s2260_s28, %s2255_s21  ;;  %p2264_p13 = scmp.lt.u32.totalorder %s2255_s21, %s2579_s11 }
  0x60   : > { %p2258_p1 = pnand %p2256_p5, %p2227_p0 }
  0x61   : > { %p2263_p10 = por %p2262_p8, %p2261_p6 }
  0x62   : > { %p2259_p4 = pneg %p2258_p1 }
  0x63   : > { %p2265_p3 = por %p2264_p13, %p2263_p10 }
  0x65   : > { %p2266_p7 = pnand %p2265_p3, %p2259_p4 }
  0x67   : > { %2269 = shalt.err (!%p2266_p7)
}
  0x68   : > { %s2270_s13 = scalar_lea.vmem %s507_s18, 128  ;;  %s2365_s0 = smov [#allocation5]  }
  0x69   : > { %p2271_p9 = scmp.ne.s32.totalorder %s507_s18, %s2270_s13  ;;  %s2275_s20 = sshll.u32 %s2365_s0, 4  ;;  %s2276_s20 = int_to_ptr.vmem [resolvable:$false] %s2275_s20 }
  0x6a   : > { %s2277_s17 = scalar_lea.vmem %s2276_s20, 256  ;;  %p2278_p1 = scmp.lt.s32.totalorder %s507_s18, %s2276_s20 }
  0x6b   : > { %p2273_p2 = pnand %p2271_p9, %p2227_p0  ;;  %p2279_p12 = scmp.lt.s32.totalorder %s2277_s17, %s2270_s13 }
  0x6d   : > { %p2274_p5 = pneg %p2273_p2  ;;  %p2280_p6 = por %p2279_p12, %p2278_p1 }
  0x6f   : > { %p2281_p8 = pnand %p2280_p6, %p2274_p5 }
  0x71   : > { %2284 = shalt.err (!%p2281_p8)
}
  0x72   : > { %2120 = dma.hbm_to_vmem [thread:$0]  (!%p2570_p11), %s2579_s11, 128, %s507_s18, %s496_s14  }
  0x73   : > { %p2927_p4 = scmp.ne.s32.totalorder %s2917_s29, 0 }
  0x74   : > { %s2630_s10 = sand.u32 (!%p2927_p4), 1, %s2351_s22   ;;  %p2928_p12 = scmp.ne.s32.totalorder (!%p2927_p4), %s2914_s27, 0 }
  0x75   : > { %515 = sbr.rel (%p2927_p4) target bundleno = 2514 (0x9d2), region = 84  ;;  %s2633_s23 = sshll.u32 (!%p2927_p4), %s2630_s10, 3 }
  0x76   : > { %s518_s21 = scalar_lea.sflag (!%p2927_p4), [#allocation3], %s2630_s10  ;;  %s521_s19 = scalar_lea.vmem (!%p2927_p4), [#allocation2], %s2633_s23 }
  0x7c   : > { %2330 = dma.done.wait (%p2928_p12), %s518_s21, 128  }
  0x7d   : > { %2332 = vsyncadd (%p2928_p12), %s518_s21, 4294967168  ;;  %s526_s29 = sand.u32 1, %s2486_s25   ;;  %s530_s11 = scalar_lea.vmem [#allocation5], %s2633_s23 }
  0x7e   : > { %s527_s16 = scalar_lea.sflag [#allocation6], %s526_s29 }
  0x7f   : > { %2334 = dma.done.wait (%p2928_p12), %s527_s16, 128  }
  0x80   : > { %2336 = vsyncadd (%p2928_p12), %s527_s16, 4294967168  ;;  %p2929_p11 = scmp.eq.s32.totalorder %s2486_s25, 0 }
  0x82   : > { %2338 = dma.done.wait (%p2929_p11), [#allocation6], 512   ;;  %p2930_p0 = pmov %p2929_p11 }
  0x83   : > { %v2366_v0 = vmov 0.0|0.0   ;;  %vm2367_vm0 = vmmov 0   ;;  %v2368_v1 = vmov 0.0   ;;  %v591_v2 = vld [vmem:[%s2876_s2] sm:$0xff]  ;;  %v592_v3 = vld [vmem:[%s2876_s2 + $0x8] sm:$0xff]  ;;  %v593_v4 = vld [vmem:[%s2876_s2 + $0x10] sm:$0xff] }
  0x84   : > { %2340 = vsyncadd (%p2930_p0), [#allocation6], 4294966784  ;;  %2064 = vmatprep.subr.bf16.mxu1 %v2366_v0  ;;  %1969 = vmatprep.mubr.msk.f32.mxu1 %vm2367_vm0, %v2368_v1  ;;  %v2065_v5 = vpack.c.bf16 %v592_v3, %v591_v2  ;;  %v594_v6 = vld [vmem:[%s2876_s2 + $0x18] sm:$0xff]  ;;  %v2669_v8 = vld [vmem:[%s521_s19] sm:$0xff]  ;;  %vm602_vm1 = vcmask 261120   ;;  %s2369_s14 = smov 96  }
  0x85   : > { %1983 = vmatprep.subr.mxu0 %v2368_v1  ;;  %1985 = vmatprep.mubr.msk.f32.mxu0 %vm2367_vm0, %v2368_v1  ;;  %v2068_v7 = vpack.c.bf16 %v594_v6, %v593_v4  ;;  %v589_v9 = vld [vmem:[%s530_s11] sm:$0xff]  ;;  %v1886_v11 = vld [vmem:[%s2877_s3] ss:$0 sm:$0xff]  ;;  %v677_v13 = vld [vmem:[%s2878_s4 + $0x8] sm:$0xff]  ;;  %s2370_s26 = smov 120   ;;  %s2371_s28 = smov 88  }
  0x86   : > { %2066 = vmatpush3.bf16.msra.mxu1 %v2065_v5  ;;  %v590_v10 = vadd.f32 %v589_v9, %v2669_v8  ;;  %v676_v12 = vld [vmem:[%s2878_s4] sm:$0xff]  ;;  %v678_v18 = vld [vmem:[%s2878_s4 + $0x10] sm:$0xff]  ;;  %v679_v19 = vld [vmem:[%s2878_s4 + $0x18] sm:$0xff]  ;;  %s2372_s30 = smov 80   ;;  %s2373_s9 = smov 112   ;;  %vm764_vm2 = vcmask 64512  }
  0x87   : > { %2067 = vmatprep.subr.bf16.mxu1 %v2366_v0  ;;  %v2071_v14 = vpack.c.bf16 %v677_v13, %v676_v12  ;;  %v2074_v21 = vpack.c.bf16 %v679_v19, %v678_v18  ;;  %s2374_s13 = smov 72   ;;  %s2375_s0 = smov 104   ;;  %v1888_v29 = vld [vmem:[%s2879_s5] ss:$0 sm:$0xff]  ;;  %v1440_v13 = vld [vmem:[%s2880_s6 + $0x18] sm:$0xff]  ;;  %vm1433_vm3 = vcmask 130048  }
  0x88   : > { %v1437_v9 = vld [vmem:[%s2880_s6] sm:$0xff]  ;;  %vm1435_vm4 = vcmask 195584   ;;  %s2932_s11 = sld [smem:[#allocation22_spill]]  ;;  %vm1652_vm5 = vcmask 523264   ;;  %s2936_s20 = sld [smem:[#allocation25_spill]] }
  0x89   : > { %s1913_s17 = sshll.u32 %s2486_s25, 7  ;;  %s587_s21 = scalar_lea.vmem [#allocation8], %s2633_s23 }
  0x8a   : > { %2069 = vmatpush3.bf16.msra.mxu1 %v2068_v7  ;;  %s1771_s19 = sshll.u32 %s587_s21, 4  ;;  %s1758_s18 = scalar_lea.sflag [#allocation4], %s2630_s10  ;;  %s2831_s19 = int_to_ptr.vmem [resolvable:$true] %s1771_s19 }
  0x8b   : > { %2070 = vmatprep.subr.bf16.mxu1 %v2366_v0  ;;  %s2379_s25 = smov [#allocation8]  }
  0x8c   : > { %s2289_s23 = sshll.u32 %s2379_s25, 4  ;;  %s2290_s23 = int_to_ptr.vmem [resolvable:$false] %s2289_s23 }
  0x8d   : > { %1970 = vmatmul.mubr.msk.f32.vlgmr.msra.gmra.mrb[0].mxu1 %vm602_vm1, %v590_v10  ;;  %v1438_v10 = vld [vmem:[%s2880_s6 + $0x8] sm:$0xff]  ;;  %p2292_p9 = scmp.lt.s32.totalorder %s2831_s19, %s2290_s23 }
  0x8e   : > { %1980 = vmatprep.mubr.msk.f32.mxu1 %vm2367_vm0, %v2368_v1  ;;  %2072 = vmatpush3.bf16.msra.mxu1 %v2071_v14  ;;  %v2077_v12 = vpack.c.bf16 %v1438_v10, %v1437_v9 }
  0x8f   : > { %2073 = vmatprep.subr.bf16.mxu1 %v2366_v0 }
  0x92   : > { %2075 = vmatpush3.bf16.msra.mxu1 %v2074_v21 }
  0x93   : > { %1988 = vmatprep.subr.mxu1 %v2368_v1 }
  0x95   : > { %1981 = vmatmul.mubr.msk.f32.vlgmr.msra.gmra.mrb[2].mxu1 %vm602_vm1, %v2669_v8 }
  0x96   : > { %1990 = vmatprep.mubr.msk.f32.mxu1 %vm2367_vm0, %v2368_v1 }
 0x160   : > { %v672_v15 = vpop.f32.mrb[0].mxu1 }
 0x161   : > { %v673_v16 = vadd.f32 %v1886_v11, %v672_v15  ;;  %v1971_v17 = vpop.f32.mrb[1].mxu1  ;;  %v1439_v11 = vld [vmem:[%s2880_s6 + $0x10] sm:$0xff] }
 0x163   : > { %762 = vrot.lane.b32.xlu0 %v673_v16, %s2369_s14  ;;  %v760_v20 = vmul.f32 0.35355338, %v673_v16  ;;  %s2933_s14 = sld [smem:[#allocation23_spill]] }
 0x165   : > { %924 = vrot.lane.b32.xlu1 %v760_v20, %s2370_s26 }
 0x167   : > { %926 = vrot.lane.b32.xlu0 %v673_v16, %s2371_s28  ;;  %s2377_s28 = smov 16  }
 0x168   : > { %v756_v30 = vpop.f32.mrb[2].mxu1 }
 0x169   : > { %1092 = vrot.lane.b32.xlu1 %v673_v16, %s2372_s30  ;;  %v757_v31 = vadd.f32 %v1888_v29, %v756_v30  ;;  %v1982_v32 = vpop.f32.mrb[3].mxu1  ;;  %s2378_s30 = smov 24  }
 0x16b   : > { %1090 = vrot.lane.b32.xlu0 %v760_v20, %s2373_s9  ;;  %1989 = vmatpush3.msra.mxu1 %v757_v31 }
 0x16c   : > { %1998 = vmatprep.subr.mxu1 %v2368_v1 }
 0x16d   : > { %1257 = vrot.lane.b32.xlu1 %v673_v16, %s2374_s13  ;;  %v2080_v16 = vpack.c.bf16 %v1440_v13, %v1439_v11  ;;  %v1644_v11 = vld [vmem:[%s2886_s12 + $0x38] sm:$0xff]  ;;  %v1906_v13 = vld [vmem:[%s2932_s11] ss:$0 sm:$0xff]  ;;  %s2937_s11 = sld [smem:[#allocation26_spill]] }
 0x16f   : > { %1255 = vrot.lane.b32.xlu0 %v760_v20, %s2375_s0 }
 0x173   : > { %s2829_s27 = scalar_lea.hbm %s2937_s11, %s1913_s17 }
 0x1d5   : > { %v763_v22 = vpop.permute.xlu0 %762 }
 0x1d6   : > { %1984 = vmatpush3.xpose.msk.msra.mxu0 %vm764_vm2, %v763_v22 }
 0x1d7   : > { %v925_v23 = vpop.permute.xlu1 %924  ;;  %1993 = vmatprep.subr.mxu0 %v2368_v1 }
 0x1d9   : > { %v927_v24 = vpop.permute.xlu0 %926  ;;  %1986 = vmatmul.mubr.msk.f32.vlgmr.msra.gmra.mrb[0].mxu0 %vm764_vm2, %v760_v20 }
 0x1da   : > { %1994 = vmatpush3.xpose.msk.msra.mxu0 %vm764_vm2, %v927_v24  ;;  %1995 = vmatprep.mubr.msk.f32.mxu0 %vm2367_vm0, %v2368_v1 }
 0x1db   : > { %v1093_v25 = vpop.permute.xlu1 %1092  ;;  %2003 = vmatprep.subr.mxu0 %v2368_v1 }
 0x1dd   : > { %1996 = vmatmul.mubr.msk.f32.vlgmr.msra.gmra.mrb[2].mxu0 %vm764_vm2, %v925_v23  ;;  %v1091_v26 = vpop.permute.xlu0 %1090 }
 0x1de   : > { %2004 = vmatpush3.xpose.msk.msra.mxu0 %vm764_vm2, %v1093_v25  ;;  %2005 = vmatprep.mubr.msk.f32.mxu0 %vm2367_vm0, %v2368_v1 }
 0x1df   : > { %2013 = vmatprep.subr.mxu0 %v2368_v1  ;;  %v1258_v27 = vpop.permute.xlu1 %1257 }
 0x1e1   : > { %2006 = vmatmul.mubr.msk.f32.vlgmr.msra.gmra.mrb[4].mxu0 %vm764_vm2, %v1091_v26  ;;  %v1256_v28 = vpop.permute.xlu0 %1255 }
 0x1e2   : > { %2014 = vmatpush3.xpose.msk.msra.mxu0 %vm764_vm2, %v1258_v27  ;;  %2015 = vmatprep.mubr.msk.f32.mxu0 %vm2367_vm0, %v2368_v1 }
 0x1e3   : > { %2076 = vmatprep.subr.bf16.mxu0 %v2366_v0 }
 0x1e5   : > { %2016 = vmatmul.mubr.msk.f32.vlgmr.msra.gmra.mrb[6].mxu0 %vm764_vm2, %v1256_v28 }
 0x1e6   : > { %2031 = vmatprep.mubr.msk.f32.mxu0 %vm2367_vm0, %v2368_v1  ;;  %2078 = vmatpush3.bf16.msra.mxu0 %v2077_v12 }
 0x1e7   : > { %2079 = vmatprep.subr.bf16.mxu0 %v2366_v0 }
 0x1ea   : > { %2081 = vmatpush3.bf16.msra.mxu0 %v2080_v16 }
 0x1eb   : > { %2088 = vmatprep.subr.bf16.mxu0 %v2366_v0 }
 0x2ac   : > { %v836_v33 = vpop.f32.mrb[0].mxu0 }
 0x2ad   : > { %v1987_v34 = vpop.f32.mrb[1].mxu0  ;;  %v840_v35 = vsel %vm764_vm2, %v836_v33, -inf }
 0x2ae   : > { %841 = vmax.xlane.f32.xlu1 %v840_v35 }
 0x2b0   : > { %v998_v36 = vpop.f32.mrb[2].mxu0 }
 0x2b1   : > { %v1997_v37 = vpop.f32.mrb[3].mxu0  ;;  %v1002_v38 = vsel %vm764_vm2, %v998_v36, -inf }
 0x2b2   : > { %1003 = vmax.xlane.f32.xlu0 %v1002_v38 }
 0x2b4   : > { %v1164_v39 = vpop.f32.mrb[4].mxu0 }
 0x2b5   : > { %v2007_v40 = vpop.f32.mrb[5].mxu0  ;;  %v1168_v41 = vsel %vm764_vm2, %v1164_v39, -inf }
 0x2b6   : > { %1169 = vmax.xlane.f32.xlu0 %v1168_v41 }
 0x2b8   : > { %v1329_v42 = vpop.f32.mrb[6].mxu0 }
 0x2b9   : > { %v2017_v43 = vpop.f32.mrb[7].mxu0  ;;  %v1333_v44 = vsel %vm764_vm2, %v1329_v42, -inf }
 0x2bf   : > { %1177 = vrot.lane.b32.xlu1 %v757_v31, %s2373_s9  ;;  %s2935_s9 = sld [smem:[#allocation24_spill]] }
 0x2cc   : > { %1012 = vrot.lane.b32.xlu0 %v757_v31, %s2370_s26  ;;  %s2376_s26 = smov 8  }
 0x2e3   : > { %1334 = vmax.xlane.f32.xlu1 %v1333_v44 }
 0x2f4   : > { %1342 = vrot.lane.b32.xlu1 %v757_v31, %s2375_s0  ;;  %s2931_s0 = sld [smem:[#allocation20_spill]] }
 0x33b   : > { %v842_v45 = vpop.xlane.xlu1 %841 }
 0x33c   : > { %v843_v46 = vsub.f32 %v836_v33, %v842_v45 }
 0x33e   : > { %v844_v47 = vmul.f32 1.442695, %v843_v46 }
 0x33f   : > { %v1004_v48 = vpop.xlane.xlu0 %1003  ;;  %v1178_v57 = vpop.permute.xlu1 %1177 }
 0x340   : > { %2177 = vpow2.f32 %v844_v47  ;;  %v1005_v49 = vsub.f32 %v998_v36, %v1004_v48 }
 0x342   : > { %v1006_v50 = vmul.f32 1.442695, %v1005_v49 }
 0x343   : > { %v1170_v51 = vpop.xlane.xlu0 %1169 }
 0x344   : > { %2179 = vpow2.f32 %v1006_v50  ;;  %v1171_v52 = vsub.f32 %v1164_v39, %v1170_v51  ;;  %v1902_v39 = vld [vmem:[%s2881_s7] ss:$0 sm:$0xff]  ;;  %v1553_v50 = vld [vmem:[#allocation7 + $0x8] sm:$0xff] }
 0x346   : > { %v1172_v53 = vmul.f32 1.442695, %v1171_v52  ;;  %v1554_v52 = vld [vmem:[#allocation7 + $0x10] sm:$0xff] }
 0x347   : > { %v1013_v55 = vpop.permute.xlu0 %1012 }
 0x348   : > { %2181 = vpow2.f32 %v1172_v53  ;;  %v1555_v53 = vld [vmem:[#allocation7 + $0x18] sm:$0xff] }
 0x34a   : > { %v2178_v54 = vpop.eup %2177 }
 0x34b   : > { %1991 = vmatmul.mubr.msk.f32.vlgmr.msra.gmra.mrb[4].mxu1 %vm764_vm2, %v2178_v54  ;;  %v846_v5 = vsel %vm764_vm2, %v2178_v54, 0.0  ;;  %v2086_v54 = vpack.c.bf16 %v1555_v53, %v1554_v52 }
 0x34c   : > { %1999 = vmatpush3.msra.mxu1 %v1013_v55  ;;  %2000 = vmatprep.mubr.msk.f32.mxu1 %vm2367_vm0, %v2368_v1  ;;  %v1638_v55 = vld [vmem:[%s2886_s12 + $0x8] sm:$0xff] }
 0x34d   : > { %2008 = vmatprep.subr.mxu1 %v2368_v1 }
 0x34e   : > { %v2180_v56 = vpop.eup %2179 }
 0x34f   : > { %2001 = vmatmul.mubr.msk.f32.vlgmr.msra.gmra.mrb[6].mxu1 %vm764_vm2, %v2180_v56  ;;  %v1008_v58 = vsel %vm764_vm2, %v2180_v56, 0.0  ;;  %v1639_v56 = vld [vmem:[%s2886_s12 + $0x10] sm:$0xff] }
 0x350   : > { %2009 = vmatpush3.msra.mxu1 %v1178_v57  ;;  %1009 = vadd.xlane.f32.xlu0 %v1008_v58  ;;  %v1640_v58 = vld [vmem:[%s2886_s12 + $0x18] sm:$0xff] }
 0x351   : > { %2010 = vmatprep.mubr.msk.f32.mxu1 %vm2367_vm0, %v2368_v1  ;;  %2018 = vmatprep.subr.mxu1 %v2368_v1 }
 0x352   : > { %v2182_v59 = vpop.eup %2181 }
 0x353   : > { %2011 = vmatmul.mubr.msk.f32.vlgmr.msra.gmra.mrb[8].mxu1 %vm764_vm2, %v2182_v59  ;;  %v1174_v60 = vsel %vm764_vm2, %v2182_v59, 0.0  ;;  %v2092_v59 = vpack.c.bf16 %v1640_v58, %v1639_v56 }
 0x354   : > { %1175 = vadd.xlane.f32.xlu1 %v1174_v60  ;;  %2020 = vmatprep.mubr.msk.f32.mxu1 %vm2367_vm0, %v2368_v1  ;;  %v1641_v60 = vld [vmem:[%s2886_s12 + $0x20] sm:$0xff] }
 0x370   : > { %v1335_v61 = vpop.xlane.xlu1 %1334 }
 0x371   : > { %v1336_v62 = vsub.f32 %v1329_v42, %v1335_v61  ;;  %v1642_v61 = vld [vmem:[%s2886_s12 + $0x28] sm:$0xff] }
 0x373   : > { %v1337_v63 = vmul.f32 1.442695, %v1336_v62  ;;  %v2095_v62 = vpack.c.bf16 %v1642_v61, %v1641_v60 }
 0x374   : > { %v1343_v2 = vpop.permute.xlu1 %1342 }
 0x375   : > { %2183 = vpow2.f32 %v1337_v63  ;;  %2019 = vmatpush3.msra.mxu1 %v1343_v2 }
 0x376   : > { %2082 = vmatprep.subr.bf16.mxu1 %v2366_v0 }
 0x37f   : > { %v2184_v3 = vpop.eup %2183 }
 0x380   : > { %2021 = vmatmul.mubr.msk.f32.vlgmr.msra.gmra.mrb[10].mxu1 %vm764_vm2, %v2184_v3  ;;  %v1339_v4 = vsel %vm764_vm2, %v2184_v3, 0.0 }
 0x381   : > { %1340 = vadd.xlane.f32.xlu0 %v1339_v4  ;;  %2042 = vmatprep.mubr.msk.f32.mxu1 %vm2367_vm0, %v2368_v1 }
 0x385   : > { %847 = vadd.xlane.f32.xlu0 %v846_v5  ;;  %v1904_v5 = vld [vmem:[%s2882_s8] ss:$0 sm:$0xff] }
 0x3dd   : > { %v1010_v6 = vpop.xlane.xlu0 %1009 }
 0x3de   : > { %2185 = vrcp.f32 %v1010_v6 }
 0x3e1   : > { %v1176_v7 = vpop.xlane.xlu1 %1175 }
 0x3e2   : > { %2187 = vrcp.f32 %v1176_v7  ;;  %v1905_v7 = vld [vmem:[%s2931_s0] ss:$0 sm:$0xff] }
 0x3e8   : > { %v2186_v17 = vpop.eup %2185 }
 0x3ec   : > { %v2188_v21 = vpop.eup %2187 }
 0x40e   : > { %v1341_v25 = vpop.xlane.xlu0 %1340 }
 0x40f   : > { %2189 = vrcp.f32 %v1341_v25 }
 0x412   : > { %v848_v30 = vpop.xlane.xlu0 %847 }
 0x413   : > { %2191 = vrcp.f32 %v848_v30 }
 0x419   : > { %v2190_v26 = vpop.eup %2189 }
 0x41d   : > { %v2192_v31 = vpop.eup %2191 }
 0x41e   : > { %v918_v14 = vpop.f32.mrb[4].mxu1 }
 0x41f   : > { %v1992_v15 = vpop.f32.mrb[5].mxu1  ;;  %v923_v33 = vmul.f32 %v2192_v31, %v918_v14 }
 0x422   : > { %v1084_v18 = vpop.f32.mrb[6].mxu1 }
 0x423   : > { %v1089_v19 = vmul.f32 %v2186_v17, %v1084_v18  ;;  %v2002_v20 = vpop.f32.mrb[7].mxu1  ;;  %v1908_v18 = vld [vmem:[%s2933_s14] ss:$0 sm:$0xff]  ;;  %s2285_s14 = scalar_lea.vmem %s2831_s19, 128 }
 0x424   : > { %p2286_p10 = scmp.ne.s32.totalorder %s2831_s19, %s2285_s14 }
 0x425   : > { %1421 = vrot.lane.b32.xlu1 %v1089_v19, %s2376_s26  ;;  %s2934_s26 = sld [smem:[#allocation18_spill]] }
 0x426   : > { %v1249_v22 = vpop.f32.mrb[8].mxu1 }
 0x427   : > { %v1254_v23 = vmul.f32 %v2188_v21, %v1249_v22  ;;  %v2012_v24 = vpop.f32.mrb[9].mxu1 }
 0x429   : > { %1425 = vrot.lane.b32.xlu0 %v1254_v23, %s2377_s28  ;;  %s2291_s28 = scalar_lea.vmem %s2290_s23, 256 }
 0x42a   : > { %p2293_p2 = scmp.lt.s32.totalorder %s2291_s28, %s2285_s14 }
 0x42b   : > { %p2938_p13 = scmp.ne.s32.totalorder %s2934_s26, 0 }
 0x42c   : > { %p2294_p5 = por %p2293_p2, %p2292_p9 }
 0x42d   : > { %p2287_p3 = pnand %p2286_p10, %p2938_p13 }
 0x42f   : > { %p2288_p7 = pneg %p2287_p3 }
 0x431   : > { %p2295_p1 = pnand %p2294_p5, %p2288_p7 }
 0x453   : > { %v1414_v27 = vpop.f32.mrb[10].mxu1 }
 0x454   : > { %v1419_v28 = vmul.f32 %v2190_v26, %v1414_v27  ;;  %v2022_v29 = vpop.f32.mrb[11].mxu1 }
 0x456   : > { %1429 = vrot.lane.b32.xlu1 %v1419_v28, %s2378_s30 }
 0x497   : > { %v1422_v32 = vpop.permute.xlu1 %1421 }
 0x498   : > { %v1432_v35 = vsel %vm764_vm2, %v923_v33, %v1422_v32  ;;  %v1910_v33 = vld [vmem:[%s2935_s9] ss:$0 sm:$0xff] }
 0x49b   : > { %v1426_v34 = vpop.permute.xlu0 %1425 }
 0x49c   : > { %v1434_v36 = vsel %vm1433_vm3, %v1432_v35, %v1426_v34  ;;  %v1911_v35 = vld [vmem:[%s2936_s20] ss:$0 sm:$0xff] }
 0x4c8   : > { %v1430_v37 = vpop.permute.xlu1 %1429 }
 0x4c9   : > { %v1436_v38 = vsel %vm1435_vm4, %v1434_v36, %v1430_v37 }
 0x4ca   : > { %2032 = vmatmul.mubr.msk.f32.vlgmr.msra.gmra.mrb[8].mxu0 %vm602_vm1, %v1436_v38 }
 0x4cb   : > { %2061 = vmatprep.mubr.msk.f32.mxu0 %vm2367_vm0, %v2368_v1  ;;  %v1552_v1 = vld [vmem:[#allocation7] sm:$0xff] }
 0x4cc   : > { %v2083_v51 = vpack.c.bf16 %v1553_v50, %v1552_v1 }
 0x4ce   : > { %2084 = vmatpush3.bf16.msra.mxu1 %v2083_v51 }
 0x4cf   : > { %2085 = vmatprep.subr.bf16.mxu1 %v2366_v0 }
 0x4d2   : > { %2087 = vmatpush3.bf16.msra.mxu1 %v2086_v54 }
 0x59d   : > { %v1517_v40 = vpop.f32.mrb[8].mxu0 }
 0x59e   : > { %v1518_v41 = vadd.f32 %v1902_v39, %v1517_v40  ;;  %v2033_v42 = vpop.f32.mrb[9].mxu0 }
 0x5a0   : > { %v1521_v43 = vadd.f32 %v1518_v41, %v2669_v8  ;;  %v1637_v8 = vld [vmem:[%s2886_s12] sm:$0xff] }
 0x5a1   : > { %v2089_v57 = vpack.c.bf16 %v1638_v55, %v1637_v8 }
 0x5a2   : > { %v1524_v44 = vsel %vm602_vm1, %v1521_v43, 0.0 }
 0x5a3   : > { %1525 = vadd.xlane.f32.xlu1 %v1524_v44  ;;  %2090 = vmatpush3.bf16.msra.mxu0 %v2089_v57 }
 0x5a4   : > { %2091 = vmatprep.subr.bf16.mxu0 %v2366_v0 }
 0x5a7   : > { %2093 = vmatpush3.bf16.msra.mxu0 %v2092_v59 }
 0x5a8   : > { %2094 = vmatprep.subr.bf16.mxu0 %v2366_v0 }
 0x5ab   : > { %2096 = vmatpush3.bf16.msra.mxu0 %v2095_v62 }
 0x5ac   : > { %2097 = vmatprep.subr.bf16.mxu0 %v2366_v0  ;;  %v1643_v0 = vld [vmem:[%s2886_s12 + $0x30] sm:$0xff] }
 0x5ad   : > { %v2098_v12 = vpack.c.bf16 %v1644_v11, %v1643_v0 }
 0x5af   : > { %2099 = vmatpush3.bf16.msra.mxu0 %v2098_v12 }
 0x630   : > { %v1526_v45 = vpop.xlane.xlu1 %1525 }
 0x631   : > { %v1528_v46 = vmul.f32 0.03125, %v1526_v45 }
 0x633   : > { %v1529_v47 = vsub.f32 %v1521_v43, %v1528_v46 }
 0x635   : > { %v1530_v48 = vmul.f32 %v1529_v47, %v1529_v47 }
 0x637   : > { %v1531_v49 = vsel %vm602_vm1, %v1530_v48, 0.0 }
 0x638   : > { %1532 = vadd.xlane.f32.xlu0 %v1531_v49 }
 0x6c5   : > { %v1533_v63 = vpop.xlane.xlu0 %1532 }
 0x6c6   : > { %v1534_v2 = vmul.f32 0.03125, %v1533_v63 }
 0x6c8   : > { %v1535_v3 = vadd.f32 1e-05, %v1534_v2 }
 0x6ca   : > { %2193 = vrsqrt.f32 %v1535_v3 }
 0x6d4   : > { %v2194_v4 = vpop.eup %2193 }
 0x6d5   : > { %v1537_v6 = vmul.f32 %v2194_v4, %v1529_v47 }
 0x6d7   : > { %v1544_v9 = vmul.f32 %v1904_v5, %v1537_v6 }
 0x6d9   : > { %v1551_v10 = vadd.f32 %v1905_v7, %v1544_v9 }
 0x6db   : > { %2043 = vmatmul.mubr.msk.f32.vlgmr.msra.gmra.mrb[12].mxu1 %vm602_vm1, %v1551_v10 }
 0x7ae   : > { %v1632_v14 = vpop.f32.mrb[12].mxu1 }
 0x7af   : > { %v1633_v15 = vadd.f32 %v1906_v13, %v1632_v14  ;;  %v2044_v16 = vpop.f32.mrb[13].mxu1 }
 0x7b1   : > { %v1636_v17 = vmax.f32 %v1633_v15, 0.0 }
 0x7b3   : > { %2062 = vmatmul.mubr.msk.f32.vlgmr.msra.gmra.mrb[10].mxu0 %vm1652_vm5, %v1636_v17 }
 0x886   : > { %v1722_v19 = vpop.f32.mrb[10].mxu0 }
 0x887   : > { %v1723_v20 = vadd.f32 %v1908_v18, %v1722_v19  ;;  %v2063_v21 = vpop.f32.mrb[11].mxu0 }
 0x889   : > { %v1726_v22 = vadd.f32 %v1723_v20, %v1551_v10 }
 0x88b   : > { %v1729_v23 = vsel %vm602_vm1, %v1726_v22, 0.0 }
 0x88c   : > { %1730 = vadd.xlane.f32.xlu0 %v1729_v23 }
 0x919   : > { %v1731_v24 = vpop.xlane.xlu0 %1730 }
 0x91a   : > { %v1732_v25 = vmul.f32 0.03125, %v1731_v24 }
 0x91c   : > { %v1733_v26 = vsub.f32 %v1726_v22, %v1732_v25 }
 0x91e   : > { %v1734_v27 = vmul.f32 %v1733_v26, %v1733_v26 }
 0x920   : > { %v1735_v28 = vsel %vm602_vm1, %v1734_v27, 0.0 }
 0x921   : > { %1736 = vadd.xlane.f32.xlu1 %v1735_v28 }
 0x9ae   : > { %v1737_v29 = vpop.xlane.xlu1 %1736 }
 0x9af   : > { %v1738_v30 = vmul.f32 0.03125, %v1737_v29 }
 0x9b1   : > { %v1739_v31 = vadd.f32 1e-05, %v1738_v30 }
 0x9b3   : > { %2195 = vrsqrt.f32 %v1739_v31 }
 0x9bd   : > { %v2196_v32 = vpop.eup %2195 }
 0x9be   : > { %v1741_v34 = vmul.f32 %v2196_v32, %v1733_v26 }
 0x9c0   : > { %v1748_v36 = vmul.f32 %v1910_v33, %v1741_v34 }
 0x9c2   : > { %v1755_v37 = vadd.f32 %v1911_v35, %v1748_v36 }
 0x9c4   : > { %1756 = vst.msk [vmem:[%s587_s21] sm:$0xff] %vm602_vm1, %v1755_v37 }
 0x9c5   : > { %2298 = shalt.err (!%p2295_p1)
}
 0x9c6   : > { %s2299_s10 = scalar_lea.hbm %s2829_s27, 128  ;;  %s2303_s13 = scalar_lea.hbm %s2937_s11, 256 }
 0x9c7   : > { %p2300_p6 = scmp.ne.s32.totalorder %s2829_s27, %s2299_s10  ;;  %p2304_p12 = scmp.lt.u32.totalorder %s2829_s27, %s2937_s11 }
 0x9c8   : > { %p2305_p11 = scmp.lt.u32.totalorder %s2303_s13, %s2299_s10  ;;  %p2307_p10 = scmp.lt.u32.totalorder %s2299_s10, %s2829_s27 }
 0x9c9   : > { %p2301_p8 = pnand %p2300_p6, %p2938_p13 }
 0x9ca   : > { %p2306_p0 = por %p2305_p11, %p2304_p12 }
 0x9cb   : > { %p2302_p4 = pneg %p2301_p8 }
 0x9cc   : > { %p2308_p3 = por %p2307_p10, %p2306_p0 }
 0x9ce   : > { %p2309_p7 = pnand %p2308_p3, %p2302_p4 }
 0x9d0   : > { %2312 = shalt.err (!%p2309_p7)
}
 0x9d1   : > { %2108 = dma.vmem_to_hbm [thread:$0]  (%p2938_p13), %s2831_s19, 128, %s2829_s27, %s1758_s18  }
 0x9d2 PF: > { %s2939_s17 = sld [smem:[#allocation13_spill]]  ;;  %s2940_s21 = sld [smem:[#allocation15_spill]] }
 0x9d3   : > { %p2942_p2 = scmp.ge.s32.totalorder %s2359_s24, 2 }
 0x9d8   : > { %s1783_s29 = sand.u32 1, %s2939_s17   ;;  %p2941_p9 = scmp.ne.s32.totalorder %s2940_s21, 0 }
 0x9d9   : > { %s1784_s16 = scalar_lea.sflag [#allocation4], %s1783_s29 }
 0x9da   : > { %p2122_p5 = pnand %p2942_p2, %p2941_p9 }
 0x9dc   : > { %2342 = dma.done.wait (!%p2122_p5), %s1784_s16, 128  }
 0x9dd   : > { %2344 = vsyncadd (!%p2122_p5), %s1784_s16, 4294967168  ;;  %s2943_s24 = sld [smem:[#allocation16_spill]]  ;;  %s2944_s14 = sld [smem:[#allocation14_spill]] }
 0x9de   : > { %s2945_s23 = sld [smem:[#allocation17_spill]]  ;;  %s2946_s21 = smov %s2351_s22 }
 0x9e3   : > { %p32_p1 = scmp.ge.s32.totalorder %s2943_s24, 4   ;;  %s2947_s22 = smov %s2944_s14 }
 0x9e5   :  { %34 = sbr.rel (!%p32_p1) target bundleno = 16 (0x10), region = 146 }
 0x9ec   :  { %1789 = vsyncpa [#allocation3], 1 }
 0x9ed   :  { %1791 = vsyncpa [#allocation3 + $0x1], 1 }
 0x9ee   :  { %1792 = vsyncpa [#allocation6], 1 }
 0x9ef   :  { %1794 = vsyncpa [#allocation6 + $0x1], 1 }
 0x9f0   :  { %1795 = vsyncpa [#allocation4], 1 }
 0x9f1   :  { %1797 = vsyncpa [#allocation4 + $0x1], 1 }

</bundles_post_ra>
